<compile_context>
chip_gen: v5e
topology: v5e:2x2
jax: 0.10.0
libtpu: 0.0.40
codegen_flags: <defaults>
</compile_context>

<pallas_src>
from functools import partial

import jax
import jax.numpy as jnp
from jax.experimental import pallas as pl
from jax.experimental.pallas import tpu as pltpu  # noqa: F401  (TPU backend assumed)


# ------------------------------ fused kernel ---------------------------------


def _enskf_fused_kernel(ens_ref, h_ref, ymean_ref, std2_ref, eye_ref,
                        noise_ref, out_ref):
    ens = ens_ref[...]        # (B, N, XDIM)
    h = h_ref[...]            # (YDIM, XDIM)
    ymean = ymean_ref[...]    # (1, YDIM)
    std2 = std2_ref[...]      # (1, YDIM)  = y_true_std**2 (precomputed in wrapper)
    eye = eye_ref[...]        # (YDIM, YDIM) identity (precomputed in wrapper)
    noise = noise_ref[...]    # (B, N, YDIM)

    b, n, xdim = ens.shape
    ydim = h.shape[0]
    inv_n = 1.0 / n

    # observation_func: Y = Ens @ H^T.  Flatten the batch so this is a plain
    # 2-D MXU push (leading-dim merge only; lane dim untouched).
    ens2 = ens.reshape(b * n, xdim)
    y = jax.lax.dot_general(ens2, h, (((1,), (1,)), ((), ())),
                            preferred_element_type=jnp.float32)
    y = y.reshape(b, n, ydim)                             # (B, N, YDIM)

    # centering
    x_m = jnp.mean(ens, axis=1, keepdims=True)            # (B, 1, XDIM)
    y_m = jnp.mean(y, axis=1, keepdims=True)              # (B, 1, YDIM)
    xc = ens - x_m
    yc = y - y_m

    # covariances: two independent batched matmuls (no concat/slice)
    cxy = jnp.einsum('bnx,bny->bxy', xc, yc,
                     preferred_element_type=jnp.float32) * inv_n   # (B, XDIM, YDIM)
    cyy = jnp.einsum('bnx,bny->bxy', yc, yc,
                     preferred_element_type=jnp.float32) * inv_n   # (B, YDIM, YDIM)

    # A = R + C_yy with R = diag(std^2)
    a = cyy + eye * std2                                   # (B, YDIM, YDIM)

    # Batched, pivot-free Gauss-Jordan inverse of the tiny SPD matrix A.
    # The ydim serially-dependent rounds are shared across all B batches.
    inv = jnp.broadcast_to(eye, (b, ydim, ydim))
    for i in range(ydim):                                  # static unroll
        piv_raw = a[:, i:i + 1, i:i + 1]                   # (B, 1, 1)
        piv = pl.reciprocal(piv_raw, approx=True)          # EUP slot
        piv = piv * (2.0 - piv_raw * piv)                  # one Newton step -> ~f32
        row_a = a[:, i:i + 1, :] * piv                     # (B, 1, YDIM)
        row_inv = inv[:, i:i + 1, :] * piv                 # (B, 1, YDIM)
        scale = a[:, :, i:i + 1] - eye[:, i:i + 1]         # (B, YDIM, 1) fused mask
        a = a - scale * row_a
        inv = inv - scale * row_inv

    # Kalman gain: K solves K @ A = C_xy  =>  K = C_xy @ A^{-1}
    k = jnp.einsum('bxy,byz->bxz', cxy, inv,
                   preferred_element_type=jnp.float32)     # (B, XDIM, YDIM)

    # innovation (ensemble-major): y_true_mean - Yc + noise * std^2
    innov_t = ymean - yc + noise * std2                    # (B, N, YDIM)
    # update^T = innov^T @ K^T
    upd_t = jnp.einsum('bny,bxy->bnx', innov_t, k,
                       preferred_element_type=jnp.float32) # (B, N, XDIM)

    out_ref[...] = ens + upd_t


# -------------------------------- wrapper -------------------------------------


@partial(jax.jit, donate_argnums=(0,))
def enskf_step(ens, h, y_true_mean, y_true_std, noise):
    """Fused Pallas implementation of EnsKFstep_module.forward.

    ens:         (B, N, XDIM)  ensemble (DONATED: aliased to the output)
    h:           (YDIM, XDIM)  linear observation operator (observation_func)
    y_true_mean: (1, YDIM)     parameter
    y_true_std:  (1, YDIM)     parameter
    noise:       (B, N, YDIM)  standard-normal draws (torch.randn analog)
    """
    B, N, XDIM = ens.shape
    YDIM = h.shape[0]

    # Loop-invariant constants computed once outside the kernel.
    std2 = jnp.square(y_true_std).astype(jnp.float32)      # (1, YDIM)
    eye = jnp.eye(YDIM, dtype=jnp.float32)                  # (YDIM, YDIM)

    flops = (2 * B * N * XDIM * YDIM            # observation matmul
             + 2 * B * N * XDIM * YDIM          # C_xy
             + 2 * B * N * YDIM * YDIM          # C_yy
             + 6 * B * YDIM * YDIM * YDIM       # Gauss-Jordan
             + 2 * B * XDIM * YDIM * YDIM       # K
             + 2 * B * N * YDIM * XDIM)         # update
    bytes_accessed = 4 * (2 * B * N * XDIM + B * N * YDIM
                          + YDIM * XDIM + YDIM * YDIM + 3 * YDIM)

    return pl.pallas_call(
        _enskf_fused_kernel,
        out_shape=jax.ShapeDtypeStruct((B, N, XDIM), jnp.float32),
        # grid=() : single invocation, full arrays resident in VMEM (KB-scale).
        input_output_aliases={0: 0},            # out buffer = donated ens buffer
        cost_estimate=pl.CostEstimate(
            flops=flops,
            transcendentals=B * YDIM,
            bytes_accessed=bytes_accessed),
    )(ens, h, y_true_mean, std2, eye, noise)


# --------------------------- pure-JAX reference --------------------------------


def enskf_step_ref(ens, h, y_true_mean, y_true_std, noise):
    """Direct transcription of the PyTorch forward (same noise draws)."""
    B, N, XDIM = ens.shape
    Y = jnp.einsum('bnx,yx->bny', ens, h)               # observation_func
    x_m = jnp.mean(ens, axis=1, keepdims=True)
    y_m = jnp.mean(Y, axis=1, keepdims=True)
    X = ens - x_m
    Yc = Y - y_m
    Xt = jnp.swapaxes(X, 1, 2)                          # (B, XDIM, N)
    Yt = jnp.swapaxes(Yc, 1, 2)                         # (B, YDIM, N)
    C_xy = jnp.matmul(Xt, jnp.swapaxes(Yt, 1, 2)) / N
    C_yy = jnp.matmul(Yt, jnp.swapaxes(Yt, 1, 2)) / N
    R = jnp.diag(jnp.square(y_true_std)[0])[None]
    A = R + C_yy
    Kt = jnp.linalg.solve(jnp.swapaxes(A, -1, -2), jnp.swapaxes(C_xy, -1, -2))
    K = jnp.swapaxes(Kt, -1, -2)
    R_2 = (jnp.swapaxes(noise, 1, 2)
           * jnp.square(y_true_std)[None, :, :].transpose(0, 2, 1))
    innov = y_true_mean.T[None] - Yt + R_2              # (B, YDIM, N)
    upd = jnp.matmul(K, innov)                          # (B, XDIM, N)
    return ens + jnp.swapaxes(upd, 1, 2)


# ---------------------------------- main ---------------------------------------


if __name__ == "__main__":
    B, N, XDIM, YDIM = 2, 16, 32, 8

    key = jax.random.PRNGKey(0)
    k_ens, k_h, k_mean, k_std, k_noise = jax.random.split(key, 5)

    ens = jax.random.normal(k_ens, (B, N, XDIM), dtype=jnp.float32)
    # deterministic parameter init (nn.Parameter(torch.randn(...)) analog)
    h = jax.random.normal(k_h, (YDIM, XDIM), dtype=jnp.float32) * 0.1
    y_true_mean = jax.random.normal(k_mean, (1, YDIM), dtype=jnp.float32)
    y_true_std = jax.random.normal(k_std, (1, YDIM), dtype=jnp.float32)
    # stochastic perturbation draws (torch.randn(Y.shape), stored (B, N, YDIM))
    noise = jax.random.normal(k_noise, (B, N, YDIM), dtype=jnp.float32)

    # Reference is computed BEFORE the kernel call: `ens` is donated to the
    # kernel and its buffer is invalid afterwards.
    ref = jax.block_until_ready(
        enskf_step_ref(ens, h, y_true_mean, y_true_std, noise))

    out = jax.block_until_ready(
        enskf_step(ens, h, y_true_mean, y_true_std, noise))

    assert out.shape == (B, N, XDIM)
    assert jnp.allclose(out, ref, rtol=2e-3, atol=2e-3), "mismatch vs reference"
    print("KERNEL_OK")
</pallas_src>

<mosaic_0001>
module attributes {stable_mosaic.version = 11 : i64} {
  func.func @_enskf_fused_kernel(%arg0: memref<2x16x32xf32, #tpu.memory_space<vmem>>, %arg1: memref<8x32xf32, #tpu.memory_space<vmem>>, %arg2: memref<1x8xf32, #tpu.memory_space<vmem>>, %arg3: memref<1x8xf32, #tpu.memory_space<vmem>>, %arg4: memref<8x8xf32, #tpu.memory_space<vmem>>, %arg5: memref<2x16x8xf32, #tpu.memory_space<vmem>>, %arg6: memref<2x16x32xf32, #tpu.memory_space<vmem>>) attributes {dimension_semantics = [], scalar_prefetch = 0 : i64, scratch_operands = 0 : i64, tpu.core_type = #tpu.core_type<tc>} {
    %c0 = arith.constant 0 : index
    %c0_0 = arith.constant 0 : index
    %c0_1 = arith.constant 0 : index
    %0 = vector.load %arg0[%c0, %c0_0, %c0_1] : memref<2x16x32xf32, #tpu.memory_space<vmem>>, vector<2x16x32xf32>
    %c0_2 = arith.constant 0 : index
    %c0_3 = arith.constant 0 : index
    %1 = vector.load %arg1[%c0_2, %c0_3] : memref<8x32xf32, #tpu.memory_space<vmem>>, vector<8x32xf32>
    %c0_4 = arith.constant 0 : index
    %c0_5 = arith.constant 0 : index
    %2 = vector.load %arg2[%c0_4, %c0_5] : memref<1x8xf32, #tpu.memory_space<vmem>>, vector<1x8xf32>
    %c0_6 = arith.constant 0 : index
    %c0_7 = arith.constant 0 : index
    %3 = vector.load %arg3[%c0_6, %c0_7] : memref<1x8xf32, #tpu.memory_space<vmem>>, vector<1x8xf32>
    %c0_8 = arith.constant 0 : index
    %c0_9 = arith.constant 0 : index
    %4 = vector.load %arg4[%c0_8, %c0_9] : memref<8x8xf32, #tpu.memory_space<vmem>>, vector<8x8xf32>
    %c0_10 = arith.constant 0 : index
    %c0_11 = arith.constant 0 : index
    %c0_12 = arith.constant 0 : index
    %5 = vector.load %arg5[%c0_10, %c0_11, %c0_12] : memref<2x16x8xf32, #tpu.memory_space<vmem>>, vector<2x16x8xf32>
    %6 = vector.shape_cast %0 : vector<2x16x32xf32> to vector<32x32xf32>
    %cst = arith.constant dense<0.000000e+00> : vector<32x8xf32>
    %7 = tpu.matmul %6, %1, %cst {dimension_numbers = #tpu.dot_dimension_numbers<[1], [1], [0], [0], [0, 0, 1, 0], [], []>} : vector<32x32xf32>, vector<8x32xf32>, vector<32x8xf32> -> vector<32x8xf32>
    %8 = vector.shape_cast %7 : vector<32x8xf32> to vector<2x16x8xf32>
    %cst_13 = arith.constant dense<0.000000e+00> : vector<2x32xf32>
    %9 = vector.multi_reduction <add>, %0, %cst_13 [1] : vector<2x16x32xf32> to vector<2x32xf32>
    %10 = vector.shape_cast %9 : vector<2x32xf32> to vector<2x1x32xf32>
    %cst_14 = arith.constant 1.600000e+01 : f32
    %11 = vector.broadcast %cst_14 : f32 to vector<2x1x32xf32>
    %12 = arith.divf %10, %11 : vector<2x1x32xf32>
    %cst_15 = arith.constant dense<0.000000e+00> : vector<2x8xf32>
    %13 = vector.multi_reduction <add>, %8, %cst_15 [1] : vector<2x16x8xf32> to vector<2x8xf32>
    %14 = vector.shape_cast %13 : vector<2x8xf32> to vector<2x1x8xf32>
    %cst_16 = arith.constant 1.600000e+01 : f32
    %15 = vector.broadcast %cst_16 : f32 to vector<2x1x8xf32>
    %16 = arith.divf %14, %15 : vector<2x1x8xf32>
    %17 = vector.broadcast %12 : vector<2x1x32xf32> to vector<2x16x32xf32>
    %18 = arith.subf %0, %17 : vector<2x16x32xf32>
    %19 = vector.broadcast %16 : vector<2x1x8xf32> to vector<2x16x8xf32>
    %20 = arith.subf %8, %19 : vector<2x16x8xf32>
    "tpu.trace_start"() <{level = 10 : i32, message = "bnx,bny->bxy"}> : () -> ()
    %cst_17 = arith.constant dense<0.000000e+00> : vector<2x32x8xf32>
    %21 = tpu.matmul %18, %20, %cst_17 {dimension_numbers = #tpu.dot_dimension_numbers<[1], [1], [2], [2], [0, 0, 0, 2, 1, 2], [0], [0]>} : vector<2x16x32xf32>, vector<2x16x8xf32>, vector<2x32x8xf32> -> vector<2x32x8xf32>
    "tpu.trace_stop"() : () -> ()
    %cst_18 = arith.constant 6.250000e-02 : f32
    %22 = vector.broadcast %cst_18 : f32 to vector<2x32x8xf32>
    %23 = arith.mulf %21, %22 : vector<2x32x8xf32>
    "tpu.trace_start"() <{level = 10 : i32, message = "bnx,bny->bxy"}> : () -> ()
    %cst_19 = arith.constant dense<0.000000e+00> : vector<2x8x8xf32>
    %24 = tpu.matmul %20, %20, %cst_19 {dimension_numbers = #tpu.dot_dimension_numbers<[1], [1], [2], [2], [0, 0, 0, 2, 1, 2], [0], [0]>} : vector<2x16x8xf32>, vector<2x16x8xf32>, vector<2x8x8xf32> -> vector<2x8x8xf32>
    "tpu.trace_stop"() : () -> ()
    %cst_20 = arith.constant 6.250000e-02 : f32
    %25 = vector.broadcast %cst_20 : f32 to vector<2x8x8xf32>
    %26 = arith.mulf %24, %25 : vector<2x8x8xf32>
    %27 = vector.broadcast %3 : vector<1x8xf32> to vector<8x8xf32>
    %28 = arith.mulf %4, %27 : vector<8x8xf32>
    %29 = vector.shape_cast %28 : vector<8x8xf32> to vector<1x8x8xf32>
    %30 = vector.broadcast %29 : vector<1x8x8xf32> to vector<2x8x8xf32>
    %31 = arith.addf %26, %30 : vector<2x8x8xf32>
    %32 = vector.shape_cast %4 : vector<8x8xf32> to vector<1x8x8xf32>
    %33 = vector.broadcast %32 : vector<1x8x8xf32> to vector<2x8x8xf32>
    %34 = vector.extract_strided_slice %31 {offsets = [0, 0, 0], sizes = [2, 1, 1], strides = [1, 1, 1]} : vector<2x8x8xf32> to vector<2x1x1xf32>
    %35 = tpu.reciprocal %34 {approx = true} : vector<2x1x1xf32> -> vector<2x1x1xf32>
    %36 = arith.mulf %34, %35 : vector<2x1x1xf32>
    %cst_21 = arith.constant 2.000000e+00 : f32
    %37 = vector.broadcast %cst_21 : f32 to vector<2x1x1xf32>
    %38 = arith.subf %37, %36 : vector<2x1x1xf32>
    %39 = arith.mulf %35, %38 : vector<2x1x1xf32>
    %40 = vector.extract_strided_slice %31 {offsets = [0, 0, 0], sizes = [2, 1, 8], strides = [1, 1, 1]} : vector<2x8x8xf32> to vector<2x1x8xf32>
    %41 = vector.broadcast %39 : vector<2x1x1xf32> to vector<2x1x8xf32>
    %42 = arith.mulf %40, %41 : vector<2x1x8xf32>
    %43 = vector.extract_strided_slice %33 {offsets = [0, 0, 0], sizes = [2, 1, 8], strides = [1, 1, 1]} : vector<2x8x8xf32> to vector<2x1x8xf32>
    %44 = vector.broadcast %39 : vector<2x1x1xf32> to vector<2x1x8xf32>
    %45 = arith.mulf %43, %44 : vector<2x1x8xf32>
    %46 = vector.extract_strided_slice %31 {offsets = [0, 0, 0], sizes = [2, 8, 1], strides = [1, 1, 1]} : vector<2x8x8xf32> to vector<2x8x1xf32>
    %47 = vector.extract_strided_slice %4 {offsets = [0, 0], sizes = [8, 1], strides = [1, 1]} : vector<8x8xf32> to vector<8x1xf32>
    %48 = vector.shape_cast %47 : vector<8x1xf32> to vector<1x8x1xf32>
    %49 = vector.broadcast %48 : vector<1x8x1xf32> to vector<2x8x1xf32>
    %50 = arith.subf %46, %49 : vector<2x8x1xf32>
    %51 = vector.broadcast %50 : vector<2x8x1xf32> to vector<2x8x8xf32>
    %52 = vector.broadcast %42 : vector<2x1x8xf32> to vector<2x8x8xf32>
    %53 = arith.mulf %51, %52 : vector<2x8x8xf32>
    %54 = arith.subf %31, %53 : vector<2x8x8xf32>
    %55 = vector.broadcast %50 : vector<2x8x1xf32> to vector<2x8x8xf32>
    %56 = vector.broadcast %45 : vector<2x1x8xf32> to vector<2x8x8xf32>
    %57 = arith.mulf %55, %56 : vector<2x8x8xf32>
    %58 = arith.subf %33, %57 : vector<2x8x8xf32>
    %59 = vector.extract_strided_slice %54 {offsets = [0, 1, 1], sizes = [2, 1, 1], strides = [1, 1, 1]} : vector<2x8x8xf32> to vector<2x1x1xf32>
    %60 = tpu.reciprocal %59 {approx = true} : vector<2x1x1xf32> -> vector<2x1x1xf32>
    %61 = arith.mulf %59, %60 : vector<2x1x1xf32>
    %cst_22 = arith.constant 2.000000e+00 : f32
    %62 = vector.broadcast %cst_22 : f32 to vector<2x1x1xf32>
    %63 = arith.subf %62, %61 : vector<2x1x1xf32>
    %64 = arith.mulf %60, %63 : vector<2x1x1xf32>
    %65 = vector.extract_strided_slice %54 {offsets = [0, 1, 0], sizes = [2, 1, 8], strides = [1, 1, 1]} : vector<2x8x8xf32> to vector<2x1x8xf32>
    %66 = vector.broadcast %64 : vector<2x1x1xf32> to vector<2x1x8xf32>
    %67 = arith.mulf %65, %66 : vector<2x1x8xf32>
    %68 = vector.extract_strided_slice %58 {offsets = [0, 1, 0], sizes = [2, 1, 8], strides = [1, 1, 1]} : vector<2x8x8xf32> to vector<2x1x8xf32>
    %69 = vector.broadcast %64 : vector<2x1x1xf32> to vector<2x1x8xf32>
    %70 = arith.mulf %68, %69 : vector<2x1x8xf32>
    %71 = vector.extract_strided_slice %54 {offsets = [0, 0, 1], sizes = [2, 8, 1], strides = [1, 1, 1]} : vector<2x8x8xf32> to vector<2x8x1xf32>
    %72 = vector.extract_strided_slice %4 {offsets = [0, 1], sizes = [8, 1], strides = [1, 1]} : vector<8x8xf32> to vector<8x1xf32>
    %73 = vector.shape_cast %72 : vector<8x1xf32> to vector<1x8x1xf32>
    %74 = vector.broadcast %73 : vector<1x8x1xf32> to vector<2x8x1xf32>
    %75 = arith.subf %71, %74 : vector<2x8x1xf32>
    %76 = vector.broadcast %75 : vector<2x8x1xf32> to vector<2x8x8xf32>
    %77 = vector.broadcast %67 : vector<2x1x8xf32> to vector<2x8x8xf32>
    %78 = arith.mulf %76, %77 : vector<2x8x8xf32>
    %79 = arith.subf %54, %78 : vector<2x8x8xf32>
    %80 = vector.broadcast %75 : vector<2x8x1xf32> to vector<2x8x8xf32>
    %81 = vector.broadcast %70 : vector<2x1x8xf32> to vector<2x8x8xf32>
    %82 = arith.mulf %80, %81 : vector<2x8x8xf32>
    %83 = arith.subf %58, %82 : vector<2x8x8xf32>
    %84 = vector.extract_strided_slice %79 {offsets = [0, 2, 2], sizes = [2, 1, 1], strides = [1, 1, 1]} : vector<2x8x8xf32> to vector<2x1x1xf32>
    %85 = tpu.reciprocal %84 {approx = true} : vector<2x1x1xf32> -> vector<2x1x1xf32>
    %86 = arith.mulf %84, %85 : vector<2x1x1xf32>
    %cst_23 = arith.constant 2.000000e+00 : f32
    %87 = vector.broadcast %cst_23 : f32 to vector<2x1x1xf32>
    %88 = arith.subf %87, %86 : vector<2x1x1xf32>
    %89 = arith.mulf %85, %88 : vector<2x1x1xf32>
    %90 = vector.extract_strided_slice %79 {offsets = [0, 2, 0], sizes = [2, 1, 8], strides = [1, 1, 1]} : vector<2x8x8xf32> to vector<2x1x8xf32>
    %91 = vector.broadcast %89 : vector<2x1x1xf32> to vector<2x1x8xf32>
    %92 = arith.mulf %90, %91 : vector<2x1x8xf32>
    %93 = vector.extract_strided_slice %83 {offsets = [0, 2, 0], sizes = [2, 1, 8], strides = [1, 1, 1]} : vector<2x8x8xf32> to vector<2x1x8xf32>
    %94 = vector.broadcast %89 : vector<2x1x1xf32> to vector<2x1x8xf32>
    %95 = arith.mulf %93, %94 : vector<2x1x8xf32>
    %96 = vector.extract_strided_slice %79 {offsets = [0, 0, 2], sizes = [2, 8, 1], strides = [1, 1, 1]} : vector<2x8x8xf32> to vector<2x8x1xf32>
    %97 = vector.extract_strided_slice %4 {offsets = [0, 2], sizes = [8, 1], strides = [1, 1]} : vector<8x8xf32> to vector<8x1xf32>
    %98 = vector.shape_cast %97 : vector<8x1xf32> to vector<1x8x1xf32>
    %99 = vector.broadcast %98 : vector<1x8x1xf32> to vector<2x8x1xf32>
    %100 = arith.subf %96, %99 : vector<2x8x1xf32>
    %101 = vector.broadcast %100 : vector<2x8x1xf32> to vector<2x8x8xf32>
    %102 = vector.broadcast %92 : vector<2x1x8xf32> to vector<2x8x8xf32>
    %103 = arith.mulf %101, %102 : vector<2x8x8xf32>
    %104 = arith.subf %79, %103 : vector<2x8x8xf32>
    %105 = vector.broadcast %100 : vector<2x8x1xf32> to vector<2x8x8xf32>
    %106 = vector.broadcast %95 : vector<2x1x8xf32> to vector<2x8x8xf32>
    %107 = arith.mulf %105, %106 : vector<2x8x8xf32>
    %108 = arith.subf %83, %107 : vector<2x8x8xf32>
    %109 = vector.extract_strided_slice %104 {offsets = [0, 3, 3], sizes = [2, 1, 1], strides = [1, 1, 1]} : vector<2x8x8xf32> to vector<2x1x1xf32>
    %110 = tpu.reciprocal %109 {approx = true} : vector<2x1x1xf32> -> vector<2x1x1xf32>
    %111 = arith.mulf %109, %110 : vector<2x1x1xf32>
    %cst_24 = arith.constant 2.000000e+00 : f32
    %112 = vector.broadcast %cst_24 : f32 to vector<2x1x1xf32>
    %113 = arith.subf %112, %111 : vector<2x1x1xf32>
    %114 = arith.mulf %110, %113 : vector<2x1x1xf32>
    %115 = vector.extract_strided_slice %104 {offsets = [0, 3, 0], sizes = [2, 1, 8], strides = [1, 1, 1]} : vector<2x8x8xf32> to vector<2x1x8xf32>
    %116 = vector.broadcast %114 : vector<2x1x1xf32> to vector<2x1x8xf32>
    %117 = arith.mulf %115, %116 : vector<2x1x8xf32>
    %118 = vector.extract_strided_slice %108 {offsets = [0, 3, 0], sizes = [2, 1, 8], strides = [1, 1, 1]} : vector<2x8x8xf32> to vector<2x1x8xf32>
    %119 = vector.broadcast %114 : vector<2x1x1xf32> to vector<2x1x8xf32>
    %120 = arith.mulf %118, %119 : vector<2x1x8xf32>
    %121 = vector.extract_strided_slice %104 {offsets = [0, 0, 3], sizes = [2, 8, 1], strides = [1, 1, 1]} : vector<2x8x8xf32> to vector<2x8x1xf32>
    %122 = vector.extract_strided_slice %4 {offsets = [0, 3], sizes = [8, 1], strides = [1, 1]} : vector<8x8xf32> to vector<8x1xf32>
    %123 = vector.shape_cast %122 : vector<8x1xf32> to vector<1x8x1xf32>
    %124 = vector.broadcast %123 : vector<1x8x1xf32> to vector<2x8x1xf32>
    %125 = arith.subf %121, %124 : vector<2x8x1xf32>
    %126 = vector.broadcast %125 : vector<2x8x1xf32> to vector<2x8x8xf32>
    %127 = vector.broadcast %117 : vector<2x1x8xf32> to vector<2x8x8xf32>
    %128 = arith.mulf %126, %127 : vector<2x8x8xf32>
    %129 = arith.subf %104, %128 : vector<2x8x8xf32>
    %130 = vector.broadcast %125 : vector<2x8x1xf32> to vector<2x8x8xf32>
    %131 = vector.broadcast %120 : vector<2x1x8xf32> to vector<2x8x8xf32>
    %132 = arith.mulf %130, %131 : vector<2x8x8xf32>
    %133 = arith.subf %108, %132 : vector<2x8x8xf32>
    %134 = vector.extract_strided_slice %129 {offsets = [0, 4, 4], sizes = [2, 1, 1], strides = [1, 1, 1]} : vector<2x8x8xf32> to vector<2x1x1xf32>
    %135 = tpu.reciprocal %134 {approx = true} : vector<2x1x1xf32> -> vector<2x1x1xf32>
    %136 = arith.mulf %134, %135 : vector<2x1x1xf32>
    %cst_25 = arith.constant 2.000000e+00 : f32
    %137 = vector.broadcast %cst_25 : f32 to vector<2x1x1xf32>
    %138 = arith.subf %137, %136 : vector<2x1x1xf32>
    %139 = arith.mulf %135, %138 : vector<2x1x1xf32>
    %140 = vector.extract_strided_slice %129 {offsets = [0, 4, 0], sizes = [2, 1, 8], strides = [1, 1, 1]} : vector<2x8x8xf32> to vector<2x1x8xf32>
    %141 = vector.broadcast %139 : vector<2x1x1xf32> to vector<2x1x8xf32>
    %142 = arith.mulf %140, %141 : vector<2x1x8xf32>
    %143 = vector.extract_strided_slice %133 {offsets = [0, 4, 0], sizes = [2, 1, 8], strides = [1, 1, 1]} : vector<2x8x8xf32> to vector<2x1x8xf32>
    %144 = vector.broadcast %139 : vector<2x1x1xf32> to vector<2x1x8xf32>
    %145 = arith.mulf %143, %144 : vector<2x1x8xf32>
    %146 = vector.extract_strided_slice %129 {offsets = [0, 0, 4], sizes = [2, 8, 1], strides = [1, 1, 1]} : vector<2x8x8xf32> to vector<2x8x1xf32>
    %147 = vector.extract_strided_slice %4 {offsets = [0, 4], sizes = [8, 1], strides = [1, 1]} : vector<8x8xf32> to vector<8x1xf32>
    %148 = vector.shape_cast %147 : vector<8x1xf32> to vector<1x8x1xf32>
    %149 = vector.broadcast %148 : vector<1x8x1xf32> to vector<2x8x1xf32>
    %150 = arith.subf %146, %149 : vector<2x8x1xf32>
    %151 = vector.broadcast %150 : vector<2x8x1xf32> to vector<2x8x8xf32>
    %152 = vector.broadcast %142 : vector<2x1x8xf32> to vector<2x8x8xf32>
    %153 = arith.mulf %151, %152 : vector<2x8x8xf32>
    %154 = arith.subf %129, %153 : vector<2x8x8xf32>
    %155 = vector.broadcast %150 : vector<2x8x1xf32> to vector<2x8x8xf32>
    %156 = vector.broadcast %145 : vector<2x1x8xf32> to vector<2x8x8xf32>
    %157 = arith.mulf %155, %156 : vector<2x8x8xf32>
    %158 = arith.subf %133, %157 : vector<2x8x8xf32>
    %159 = vector.extract_strided_slice %154 {offsets = [0, 5, 5], sizes = [2, 1, 1], strides = [1, 1, 1]} : vector<2x8x8xf32> to vector<2x1x1xf32>
    %160 = tpu.reciprocal %159 {approx = true} : vector<2x1x1xf32> -> vector<2x1x1xf32>
    %161 = arith.mulf %159, %160 : vector<2x1x1xf32>
    %cst_26 = arith.constant 2.000000e+00 : f32
    %162 = vector.broadcast %cst_26 : f32 to vector<2x1x1xf32>
    %163 = arith.subf %162, %161 : vector<2x1x1xf32>
    %164 = arith.mulf %160, %163 : vector<2x1x1xf32>
    %165 = vector.extract_strided_slice %154 {offsets = [0, 5, 0], sizes = [2, 1, 8], strides = [1, 1, 1]} : vector<2x8x8xf32> to vector<2x1x8xf32>
    %166 = vector.broadcast %164 : vector<2x1x1xf32> to vector<2x1x8xf32>
    %167 = arith.mulf %165, %166 : vector<2x1x8xf32>
    %168 = vector.extract_strided_slice %158 {offsets = [0, 5, 0], sizes = [2, 1, 8], strides = [1, 1, 1]} : vector<2x8x8xf32> to vector<2x1x8xf32>
    %169 = vector.broadcast %164 : vector<2x1x1xf32> to vector<2x1x8xf32>
    %170 = arith.mulf %168, %169 : vector<2x1x8xf32>
    %171 = vector.extract_strided_slice %154 {offsets = [0, 0, 5], sizes = [2, 8, 1], strides = [1, 1, 1]} : vector<2x8x8xf32> to vector<2x8x1xf32>
    %172 = vector.extract_strided_slice %4 {offsets = [0, 5], sizes = [8, 1], strides = [1, 1]} : vector<8x8xf32> to vector<8x1xf32>
    %173 = vector.shape_cast %172 : vector<8x1xf32> to vector<1x8x1xf32>
    %174 = vector.broadcast %173 : vector<1x8x1xf32> to vector<2x8x1xf32>
    %175 = arith.subf %171, %174 : vector<2x8x1xf32>
    %176 = vector.broadcast %175 : vector<2x8x1xf32> to vector<2x8x8xf32>
    %177 = vector.broadcast %167 : vector<2x1x8xf32> to vector<2x8x8xf32>
    %178 = arith.mulf %176, %177 : vector<2x8x8xf32>
    %179 = arith.subf %154, %178 : vector<2x8x8xf32>
    %180 = vector.broadcast %175 : vector<2x8x1xf32> to vector<2x8x8xf32>
    %181 = vector.broadcast %170 : vector<2x1x8xf32> to vector<2x8x8xf32>
    %182 = arith.mulf %180, %181 : vector<2x8x8xf32>
    %183 = arith.subf %158, %182 : vector<2x8x8xf32>
    %184 = vector.extract_strided_slice %179 {offsets = [0, 6, 6], sizes = [2, 1, 1], strides = [1, 1, 1]} : vector<2x8x8xf32> to vector<2x1x1xf32>
    %185 = tpu.reciprocal %184 {approx = true} : vector<2x1x1xf32> -> vector<2x1x1xf32>
    %186 = arith.mulf %184, %185 : vector<2x1x1xf32>
    %cst_27 = arith.constant 2.000000e+00 : f32
    %187 = vector.broadcast %cst_27 : f32 to vector<2x1x1xf32>
    %188 = arith.subf %187, %186 : vector<2x1x1xf32>
    %189 = arith.mulf %185, %188 : vector<2x1x1xf32>
    %190 = vector.extract_strided_slice %179 {offsets = [0, 6, 0], sizes = [2, 1, 8], strides = [1, 1, 1]} : vector<2x8x8xf32> to vector<2x1x8xf32>
    %191 = vector.broadcast %189 : vector<2x1x1xf32> to vector<2x1x8xf32>
    %192 = arith.mulf %190, %191 : vector<2x1x8xf32>
    %193 = vector.extract_strided_slice %183 {offsets = [0, 6, 0], sizes = [2, 1, 8], strides = [1, 1, 1]} : vector<2x8x8xf32> to vector<2x1x8xf32>
    %194 = vector.broadcast %189 : vector<2x1x1xf32> to vector<2x1x8xf32>
    %195 = arith.mulf %193, %194 : vector<2x1x8xf32>
    %196 = vector.extract_strided_slice %179 {offsets = [0, 0, 6], sizes = [2, 8, 1], strides = [1, 1, 1]} : vector<2x8x8xf32> to vector<2x8x1xf32>
    %197 = vector.extract_strided_slice %4 {offsets = [0, 6], sizes = [8, 1], strides = [1, 1]} : vector<8x8xf32> to vector<8x1xf32>
    %198 = vector.shape_cast %197 : vector<8x1xf32> to vector<1x8x1xf32>
    %199 = vector.broadcast %198 : vector<1x8x1xf32> to vector<2x8x1xf32>
    %200 = arith.subf %196, %199 : vector<2x8x1xf32>
    %201 = vector.broadcast %200 : vector<2x8x1xf32> to vector<2x8x8xf32>
    %202 = vector.broadcast %192 : vector<2x1x8xf32> to vector<2x8x8xf32>
    %203 = arith.mulf %201, %202 : vector<2x8x8xf32>
    %204 = arith.subf %179, %203 : vector<2x8x8xf32>
    %205 = vector.broadcast %200 : vector<2x8x1xf32> to vector<2x8x8xf32>
    %206 = vector.broadcast %195 : vector<2x1x8xf32> to vector<2x8x8xf32>
    %207 = arith.mulf %205, %206 : vector<2x8x8xf32>
    %208 = arith.subf %183, %207 : vector<2x8x8xf32>
    %209 = vector.extract_strided_slice %204 {offsets = [0, 7, 7], sizes = [2, 1, 1], strides = [1, 1, 1]} : vector<2x8x8xf32> to vector<2x1x1xf32>
    %210 = tpu.reciprocal %209 {approx = true} : vector<2x1x1xf32> -> vector<2x1x1xf32>
    %211 = arith.mulf %209, %210 : vector<2x1x1xf32>
    %cst_28 = arith.constant 2.000000e+00 : f32
    %212 = vector.broadcast %cst_28 : f32 to vector<2x1x1xf32>
    %213 = arith.subf %212, %211 : vector<2x1x1xf32>
    %214 = arith.mulf %210, %213 : vector<2x1x1xf32>
    %215 = vector.extract_strided_slice %208 {offsets = [0, 7, 0], sizes = [2, 1, 8], strides = [1, 1, 1]} : vector<2x8x8xf32> to vector<2x1x8xf32>
    %216 = vector.broadcast %214 : vector<2x1x1xf32> to vector<2x1x8xf32>
    %217 = arith.mulf %215, %216 : vector<2x1x8xf32>
    %218 = vector.extract_strided_slice %204 {offsets = [0, 0, 7], sizes = [2, 8, 1], strides = [1, 1, 1]} : vector<2x8x8xf32> to vector<2x8x1xf32>
    %219 = vector.extract_strided_slice %4 {offsets = [0, 7], sizes = [8, 1], strides = [1, 1]} : vector<8x8xf32> to vector<8x1xf32>
    %220 = vector.shape_cast %219 : vector<8x1xf32> to vector<1x8x1xf32>
    %221 = vector.broadcast %220 : vector<1x8x1xf32> to vector<2x8x1xf32>
    %222 = arith.subf %218, %221 : vector<2x8x1xf32>
    %223 = vector.broadcast %222 : vector<2x8x1xf32> to vector<2x8x8xf32>
    %224 = vector.broadcast %217 : vector<2x1x8xf32> to vector<2x8x8xf32>
    %225 = arith.mulf %223, %224 : vector<2x8x8xf32>
    %226 = arith.subf %208, %225 : vector<2x8x8xf32>
    "tpu.trace_start"() <{level = 10 : i32, message = "bxy,byz->bxz"}> : () -> ()
    %cst_29 = arith.constant dense<0.000000e+00> : vector<2x32x8xf32>
    %227 = tpu.matmul %23, %226, %cst_29 {dimension_numbers = #tpu.dot_dimension_numbers<[2], [1], [1], [2], [0, 0, 0, 1, 1, 2], [0], [0]>} : vector<2x32x8xf32>, vector<2x8x8xf32>, vector<2x32x8xf32> -> vector<2x32x8xf32>
    "tpu.trace_stop"() : () -> ()
    %228 = vector.shape_cast %2 : vector<1x8xf32> to vector<1x1x8xf32>
    %229 = vector.broadcast %228 : vector<1x1x8xf32> to vector<2x16x8xf32>
    %230 = arith.subf %229, %20 : vector<2x16x8xf32>
    %231 = vector.shape_cast %3 : vector<1x8xf32> to vector<1x1x8xf32>
    %232 = vector.broadcast %231 : vector<1x1x8xf32> to vector<2x16x8xf32>
    %233 = arith.mulf %5, %232 : vector<2x16x8xf32>
    %234 = arith.addf %230, %233 : vector<2x16x8xf32>
    "tpu.trace_start"() <{level = 10 : i32, message = "bny,bxy->bnx"}> : () -> ()
    %cst_30 = arith.constant dense<0.000000e+00> : vector<2x16x32xf32>
    %235 = tpu.matmul %234, %227, %cst_30 {dimension_numbers = #tpu.dot_dimension_numbers<[2], [2], [1], [1], [0, 0, 0, 1, 1, 1], [0], [0]>} : vector<2x16x8xf32>, vector<2x32x8xf32>, vector<2x16x32xf32> -> vector<2x16x32xf32>
    "tpu.trace_stop"() : () -> ()
    %236 = arith.addf %0, %235 : vector<2x16x32xf32>
    %c0_31 = arith.constant 0 : index
    %c0_32 = arith.constant 0 : index
    %c0_33 = arith.constant 0 : index
    %237 = vector.load %arg6[%c0_31, %c0_32, %c0_33] : memref<2x16x32xf32, #tpu.memory_space<vmem>>, vector<2x16x32xf32>
    tpu.vector_store %arg6[%c0_31, %c0_32, %c0_33], %236 {strides = array<i32>} : memref<2x16x32xf32, #tpu.memory_space<vmem>>, vector<2x16x32xf32>,
    return
  }
}

</mosaic_0001>

<bundles_post_ra>
// kernel: square.1
= control target key start
LH: loop header
LB: loop body
LE: loop exit
PB: predicated region body
PF: predicated region fallthrough
CT: control target
= control target key end

     0   :  { %s34_s0 = inlined_call_operand.vmem [shape: f32[1,8], index: 0, kind: input, shape index: {}, may-alias: {0,1}]   ;;  %s35_s1 = inlined_call_operand.vmem [shape: f32[1,8], index: 1, kind: input, shape index: {}, may-alias: {0,1}]   ;;  %s36_s2 = inlined_call_operand.vmem [shape: f32[1,8], index: 2, kind: output, shape index: {}]  }
   0x1   :  { %v3_v0 = vld [vmem:[%s34_s0] sm:$0x1] }
   0x2   :  { %v4_v1 = vld [vmem:[%s35_s1] sm:$0x1] }
   0x3   :  { %v7_v2 = vmul.f32 %v4_v1, %v3_v0 }
   0x5   :  { %9 = vst [vmem:[%s36_s2] sm:$0x1] %v7_v2 }

// kernel: enskf_step.1
= control target key start
LH: loop header
LB: loop body
LE: loop exit
PB: predicated region body
PF: predicated region fallthrough
CT: control target
= control target key end

     0   :  { %11 = vsyncpa [#allocation3], 0  ;;  %s1376_s0 = inlined_call_operand.hbm [shape: f32[2,16,32], index: 0, kind: input, shape index: {}, may-alias: {0,6}]   ;;  %s1377_s1 = inlined_call_operand.vmem [shape: f32[8,32], index: 1, kind: input, shape index: {}]   ;;  %s1378_s2 = inlined_call_operand.vmem [shape: f32[1,8], index: 2, kind: input, shape index: {}]   ;;  %s1379_s3 = inlined_call_operand.vmem [shape: f32[1,8], index: 3, kind: input, shape index: {}]   ;;  %s1380_s4 = inlined_call_operand.vmem [shape: f32[8,8], index: 4, kind: input, shape index: {}]   ;;  %s1381_s5 = inlined_call_operand.vmem [shape: f32[2,16,8], index: 5, kind: input, shape index: {}]   ;;  %s1382_s6 = inlined_call_operand.hbm [shape: f32[2,16,32], index: 6, kind: output, shape index: {}, may-alias: {0,6}]  }
   0x1   :  { %12 = vsyncpa [#allocation4], 0  ;;  %s17_s23 = sshll.u32 %s1376_s0, 4  ;;  %s1145_s24 = smov [#allocation2]   ;;  %s18_s23 = int_to_ptr.hbm [resolvable:$true] %s17_s23 }
   0x2   :  { %s19_s25 = sshll.u32 %s1145_s24, 4  ;;  %s1146_s26 = smov 128   ;;  %s20_s25 = int_to_ptr.vmem [resolvable:$true] %s19_s25 }
   0x3   :  { %s1147_s27 = smov 8  }
   0x4   :  { %25 = dma.hbm_to_vmem [thread:$0]  %s18_s23, 512, %s20_s25, [#allocation3], %s1146_s26, %s1146_s26, %s1147_s27  }
   0x5   :  { %1141 = dma.done.wait [#allocation3], 512  }
   0x6   :  { %1142 = vsyncadd [#allocation3], 4294966784  ;;  %vm52_vm0 = vcmask 261120   ;;  %v44_v0 = vld [vmem:[%s1377_s1] sm:$0xff]  ;;  %v1206_v2 = vld [vmem:[#allocation2 + $0x18] sm:$0xff]  ;;  %v1148_v5 = vmov 16.0  }
   0x7   :  { %992 = vmatpush.xpose.msk.msra.mxu0 %vm52_vm0, %v44_v0  ;;  %v1203_v1 = vld [vmem:[#allocation2] sm:$0xff]  ;;  %1027 = vmatpush.xpose.msk.msra.mxu1 %vm52_vm0, %v44_v0  ;;  %v1212_v3 = vld [vmem:[#allocation2 + $0x8] sm:$0xff]  ;;  %v1216_v4 = vld [vmem:[#allocation2 + $0x10] sm:$0xff]  ;;  %1059 = vrcp.f32 %v1148_v5  ;;  %vm124_vm1 = vcmask 64512   ;;  %vm185_vm3 = vcmask 130048   ;;  %v1149_v42 = vmov 0  }
   0x8   :  { %1042 = vset.pattern.permute.xlu2 %v1149_v42  ;;  %v1253_v43 = vld [vmem:[%s1380_s4] sm:$0xff]  ;;  %v1150_v62 = vmov 1   ;;  %s979_s18 = sshll.u32 %s1382_s6, 4  ;;  %s980_s18 = int_to_ptr.hbm [resolvable:$true] %s979_s18 }
   0x9   :  { %v1258_v44 = vld [vmem:[%s1379_s3] ss:$0 sm:$0xff] }
   0xa   :  { %993 = vmatmul.msk.f32.vlgmr.msra.gmra.mxu0 %vm52_vm0, %v1203_v1  ;;  %996 = vmatmul.msk.f32.vlgmr.msra.gmra.mxu1 %vm52_vm0, %v1206_v2  ;;  %v423_v45 = vmul.f32 %v1258_v44, %v1253_v43 }
   0xd   :  { %v1060_v7 = vpop.eup %1059 }
   0xe   :  { %v116_v8 = vmul.f32 16.0, %v1060_v7  ;;  %vm120_vm2 = vweird.f32 %v1060_v7 }
  0x10   :  { %v117_v10 = vsub.f32 1.0, %v116_v8 }
  0x12   :  { %994 = vmatmul.msk.f32.gmra.mxu0 %vm52_vm0, %v1212_v3  ;;  %v118_v16 = vmul.f32 %v1060_v7, %v117_v10 }
  0x14   :  { %v119_v21 = vadd.f32 %v1060_v7, %v118_v16 }
  0x16   :  { %v1224_v27 = vsel %vm120_vm2, %v1060_v7, %v119_v21 }
  0x1a   :  { %995 = vmatmul.msk.f32.gmra.mxu0 %vm52_vm0, %v1216_v4 }
  0x87   :  { %v85_v6 = vpop.f32.mrf.mxu0  ;;  %v94_v15 = vpop.f32.mrf.mxu1 }
  0x88   :  { %v125_v11 = vsel %vm124_vm1, %v85_v6, 0.0  ;;  %v135_v18 = vsel %vm124_vm1, %v94_v15, 0.0 }
  0x8f   :  { %v88_v9 = vpop.f32.mrf.mxu0 }
  0x90   :  { %v126_v12 = vsel %vm124_vm1, %v88_v9, 0.0 }
  0x91   :  { %v127_v13 = vadd.f32 %v126_v12, %v125_v11 }
  0x93   :  { %v128_v14 = vrot.slane %v127_v13, 4 }
  0x95   :  { %v129_v17 = vadd.f32 %v128_v14, %v127_v13 }
  0x97   :  { %v130_v19 = vrot.slane %v129_v17, 2  ;;  %v91_v20 = vpop.f32.mrf.mxu0 }
  0x98   :  { %v134_v22 = vsel %vm124_vm1, %v91_v20, 0.0 }
  0x99   :  { %v131_v23 = vadd.f32 %v130_v19, %v129_v17  ;;  %v136_v24 = vadd.f32 %v135_v18, %v134_v22 }
  0x9b   :  { %v132_v25 = vrot.slane %v131_v23, 1  ;;  %v137_v26 = vrot.slane %v136_v24, 4 }
  0x9d   :  { %v133_v28 = vadd.f32 %v132_v25, %v131_v23  ;;  %v138_v29 = vadd.f32 %v137_v26, %v136_v24  ;;  %v1151_v25 = vmov 2  }
  0x9f   :  { %v143_v30 = vmul.f32 %v133_v28, %v1224_v27  ;;  %v139_v31 = vrot.slane %v138_v29, 2 }
  0xa1   :  { %v1227_v32 = vsub.f32 %v85_v6, %v143_v30  ;;  %v1229_v33 = vsub.f32 %v88_v9, %v143_v30  ;;  %v140_v34 = vadd.f32 %v139_v31, %v138_v29 }
  0xa3   :  { %v141_v35 = vrot.slane %v140_v34, 1  ;;  %212 = vmatpush.msrb.mxu1 %v1229_v33  ;;  %357 = vmatpush.msra.mxu3 %v1229_v33 }
  0xa4   :  { %308 = vxpose.xlu0.b32.start [1/2] (short) (narrow) %v1227_v32, 8 }
  0xa5   :  { %v142_v36 = vadd.f32 %v141_v35, %v140_v34  ;;  %213 = vmatpush.msrb.mxu1 %v1227_v32  ;;  %358 = vmatpush.msra.mxu3 %v1227_v32 }
  0xa7   :  { %v144_v37 = vmul.f32 %v142_v36, %v1224_v27 }
  0xa9   :  { %v1237_v38 = vsub.f32 %v91_v20, %v144_v37  ;;  %v1239_v39 = vsub.f32 %v94_v15, %v144_v37 }
  0xab   :  { %285 = vmatpush.msra.mxu2 %v1239_v39  ;;  %412 = vmatpush.msrb.mxu3 %v1239_v39 }
  0xac   :  { %309 = vxpose.xlu0.b32.end [2/2] (short) (narrow) %v1229_v33, 8  ;;  %363 = vxpose.xlu1.b32.start [1/2] (short) (narrow) %v1237_v38, 8 }
  0xad   :  { %286 = vmatpush.msra.mxu2 %v1237_v38  ;;  %413 = vmatpush.msrb.mxu3 %v1237_v38 }
  0xb4   :  { %364 = vxpose.xlu1.b32.end [2/2] (short) (narrow) %v1239_v39, 8 }
 0x107   :  { %1044 = vset.pattern.permute.xlu1 %v1149_v42 }
 0x113   :  { %1043 = vset.pattern.permute.xlu0 %v1149_v42 }
 0x148   :  { %v324_v40 = vpop.trf.xlu0 }
 0x149   :  { %1005 = vmatmul.msk.f32.vlgmr.msra.gmra.mxu3 %vm185_vm3, %v324_v40 }
 0x150   :  { %v379_v41 = vpop.trf.xlu1 }
 0x151   :  { %1006 = vmatmul.msk.f32.vlgmr.msrb.gmra.mxu3 %vm185_vm3, %v379_v41 }
 0x1cc   :  { %v360_v46 = vpop.f32.mrf.mxu3 }
 0x1cd   :  { %v418_v47 = vmul.f32 0.0625, %v360_v46 }
 0x1cf   :  { %v424_v48 = vadd.f32 %v423_v45, %v418_v47 }
 0x1d1   :  { %v448_v49 = vsub.f32 %v424_v48, %v1253_v43  ;;  %1061 = vrcp.f32 %v424_v48 }
 0x1d3   :  { %452 = vperm.xlu0 %1043, %v448_v49  }
 0x1d4   :  { %v415_v50 = vpop.f32.mrf.mxu3 }
 0x1d5   :  { %v419_v51 = vmul.f32 0.0625, %v415_v50 }
 0x1d7   :  { %v1062_v52 = vpop.eup %1061  ;;  %v425_v53 = vadd.f32 %v423_v45, %v419_v51 }
 0x1d8   :  { %v428_v54 = vmul.f32 %v1062_v52, %v424_v48 }
 0x1d9   :  { %v449_v55 = vsub.f32 %v425_v53, %v1253_v43  ;;  %1063 = vrcp.f32 %v425_v53 }
 0x1da   :  { %v430_v56 = vsub.f32 2.0, %v428_v54 }
 0x1db   :  { %457 = vperm.xlu1 %1044, %v449_v55  }
 0x1dc   :  { %v432_v57 = vmul.f32 %v1062_v52, %v430_v56 }
 0x1de   :  { %436 = vperm.xlu2 %1042, %v432_v57  }
 0x1df   :  { %v1064_v58 = vpop.eup %1063 }
 0x1e0   :  { %v429_v59 = vmul.f32 %v1064_v58, %v425_v53 }
 0x1e2   :  { %v431_v60 = vsub.f32 2.0, %v429_v59 }
 0x1e4   :  { %v433_v61 = vmul.f32 %v1064_v58, %v431_v60 }
 0x1e6   :  { %441 = vperm.xlu2 %1042, %v433_v61  }
 0x1ee   :  { %1045 = vset.pattern.permute.xlu2 %v1150_v62 }
 0x238   :  { %v437_v63 = vpop.permute.xlu2 %436 }
 0x239   :  { %v444_v0 = vmul.f32 %v437_v63, %v424_v48  ;;  %v446_v26 = vmul.f32 %v437_v63, %v1253_v43  ;;  %v1152_v63 = vmov 3  }
 0x23b   :  { %v460_v5 = vperm.slane %v444_v0, 0  ;;  %v466_v29 = vperm.slane %v446_v26, 0 }
 0x240   :  { %v1264_v6 = vpop.permute.xlu2 %441 }
 0x241   :  { %v445_v9 = vmul.f32 %v1264_v6, %v425_v53  ;;  %v447_v0 = vmul.f32 %v1264_v6, %v1253_v43 }
 0x243   :  { %v461_v12 = vperm.slane %v445_v9, 0 }
 0x245   :  { %v453_v7 = vpop.permute.xlu0 %452 }
 0x246   :  { %v462_v8 = vmul.f32 %v460_v5, %v453_v7  ;;  %v468_v30 = vmul.f32 %v466_v29, %v453_v7  ;;  %v467_v7 = vperm.slane %v447_v0, 0 }
 0x248   :  { %v464_v10 = vsub.f32 %v424_v48, %v462_v8  ;;  %v470_v31 = vsub.f32 %v1253_v43, %v468_v30 }
 0x24a   :  { %v494_v11 = vsub.f32 %v464_v10, %v1253_v43  ;;  %1065 = vrcp.f32 %v464_v10 }
 0x24c   :  { %498 = vperm.xlu2 %1045, %v494_v11  }
 0x24d   :  { %v458_v13 = vpop.permute.xlu1 %457 }
 0x24e   :  { %v463_v14 = vmul.f32 %v461_v12, %v458_v13  ;;  %v469_v8 = vmul.f32 %v467_v7, %v458_v13 }
 0x250   :  { %v1066_v15 = vpop.eup %1065  ;;  %v465_v16 = vsub.f32 %v425_v53, %v463_v14  ;;  %v471_v9 = vsub.f32 %v1253_v43, %v469_v8 }
 0x251   :  { %v474_v17 = vmul.f32 %v1066_v15, %v464_v10 }
 0x252   :  { %1067 = vrcp.f32 %v465_v16  ;;  %v495_v24 = vsub.f32 %v465_v16, %v1253_v43 }
 0x253   :  { %v476_v18 = vsub.f32 2.0, %v474_v17 }
 0x255   :  { %v478_v19 = vmul.f32 %v1066_v15, %v476_v18 }
 0x257   :  { %482 = vperm.xlu2 %1045, %v478_v19  }
 0x258   :  { %v1068_v20 = vpop.eup %1067 }
 0x259   :  { %v475_v21 = vmul.f32 %v1068_v20, %v465_v16 }
 0x25b   :  { %v477_v22 = vsub.f32 2.0, %v475_v21 }
 0x25d   :  { %v479_v23 = vmul.f32 %v1068_v20, %v477_v22 }
 0x25f   :  { %487 = vperm.xlu2 %1045, %v479_v23  }
 0x267   :  { %503 = vperm.xlu2 %1045, %v495_v24  }
 0x26f   :  { %1046 = vset.pattern.permute.xlu2 %v1151_v25 }
 0x2a6   :  { %v499_v28 = vpop.permute.xlu2 %498 }
 0x2b1   :  { %v483_v34 = vpop.permute.xlu2 %482 }
 0x2b2   :  { %v490_v35 = vmul.f32 %v483_v34, %v464_v10  ;;  %v492_v36 = vmul.f32 %v483_v34, %v470_v31 }
 0x2b4   :  { %v506_v37 = vperm.slane %v490_v35, 1  ;;  %v512_v40 = vperm.slane %v492_v36, 1 }
 0x2b6   :  { %v508_v41 = vmul.f32 %v506_v37, %v499_v28  ;;  %v514_v42 = vmul.f32 %v512_v40, %v499_v28 }
 0x2b8   :  { %v510_v45 = vsub.f32 %v464_v10, %v508_v41  ;;  %v516_v46 = vsub.f32 %v470_v31, %v514_v42 }
 0x2b9   :  { %v488_v47 = vpop.permute.xlu2 %487 }
 0x2ba   :  { %v540_v48 = vsub.f32 %v510_v45, %v1253_v43  ;;  %1069 = vrcp.f32 %v510_v45  ;;  %v491_v49 = vmul.f32 %v488_v47, %v465_v16  ;;  %v493_v11 = vmul.f32 %v488_v47, %v471_v9 }
 0x2bc   :  { %544 = vperm.xlu2 %1046, %v540_v48   ;;  %v507_v51 = vperm.slane %v491_v49, 1  ;;  %v513_v17 = vperm.slane %v493_v11, 1  ;;  %v1153_v49 = vmov 4  }
 0x2bd   :  { %1048 = vset.pattern.permute.xlu1 %v1153_v49 }
 0x2c0   :  { %v1070_v50 = vpop.eup %1069 }
 0x2c1   :  { %v504_v52 = vpop.permute.xlu2 %503  ;;  %v520_v53 = vmul.f32 %v1070_v50, %v510_v45 }
 0x2c2   :  { %v509_v54 = vmul.f32 %v507_v51, %v504_v52  ;;  %v515_v20 = vmul.f32 %v513_v17, %v504_v52 }
 0x2c3   :  { %v522_v55 = vsub.f32 2.0, %v520_v53 }
 0x2c4   :  { %v511_v56 = vsub.f32 %v465_v16, %v509_v54  ;;  %v517_v6 = vsub.f32 %v471_v9, %v515_v20 }
 0x2c5   :  { %v524_v57 = vmul.f32 %v1070_v50, %v522_v55 }
 0x2c6   :  { %1071 = vrcp.f32 %v511_v56  ;;  %v541_v62 = vsub.f32 %v511_v56, %v1253_v43 }
 0x2c7   :  { %528 = vperm.xlu2 %1046, %v524_v57  }
 0x2cc   :  { %v1072_v58 = vpop.eup %1071 }
 0x2cd   :  { %v521_v59 = vmul.f32 %v1072_v58, %v511_v56 }
 0x2cf   :  { %v523_v60 = vsub.f32 2.0, %v521_v59 }
 0x2d1   :  { %v525_v61 = vmul.f32 %v1072_v58, %v523_v60 }
 0x2d3   :  { %533 = vperm.xlu2 %1046, %v525_v61  }
 0x2db   :  { %549 = vperm.xlu2 %1046, %v541_v62  }
 0x2e3   :  { %1047 = vset.pattern.permute.xlu2 %v1152_v63 }
 0x316   :  { %v545_v5 = vpop.permute.xlu2 %544 }
 0x321   :  { %v529_v10 = vpop.permute.xlu2 %528 }
 0x322   :  { %v536_v12 = vmul.f32 %v529_v10, %v510_v45  ;;  %v538_v14 = vmul.f32 %v529_v10, %v516_v46 }
 0x324   :  { %v552_v15 = vperm.slane %v536_v12, 2  ;;  %v558_v16 = vperm.slane %v538_v14, 2 }
 0x326   :  { %v554_v18 = vmul.f32 %v552_v15, %v545_v5  ;;  %v560_v19 = vmul.f32 %v558_v16, %v545_v5 }
 0x328   :  { %v556_v21 = vsub.f32 %v510_v45, %v554_v18  ;;  %v562_v22 = vsub.f32 %v516_v46, %v560_v19 }
 0x32a   :  { %v586_v23 = vsub.f32 %v556_v21, %v1253_v43  ;;  %1073 = vrcp.f32 %v556_v21 }
 0x32c   :  { %590 = vperm.xlu2 %1047, %v586_v23  }
 0x32d   :  { %v534_v13 = vpop.permute.xlu2 %533 }
 0x32e   :  { %v539_v24 = vmul.f32 %v534_v13, %v517_v6  ;;  %v537_v26 = vmul.f32 %v534_v13, %v511_v56 }
 0x330   :  { %v1074_v25 = vpop.eup %1073  ;;  %v553_v30 = vperm.slane %v537_v26, 2  ;;  %v559_v31 = vperm.slane %v539_v24, 2 }
 0x331   :  { %v566_v28 = vmul.f32 %v1074_v25, %v556_v21 }
 0x333   :  { %v568_v29 = vsub.f32 2.0, %v566_v28 }
 0x335   :  { %v550_v34 = vpop.permute.xlu2 %549  ;;  %v570_v35 = vmul.f32 %v1074_v25, %v568_v29 }
 0x336   :  { %v555_v36 = vmul.f32 %v553_v30, %v550_v34  ;;  %v561_v37 = vmul.f32 %v559_v31, %v550_v34 }
 0x337   :  { %574 = vperm.xlu2 %1047, %v570_v35  }
 0x338   :  { %v557_v40 = vsub.f32 %v511_v56, %v555_v36  ;;  %v563_v41 = vsub.f32 %v517_v6, %v561_v37 }
 0x33a   :  { %1075 = vrcp.f32 %v557_v40  ;;  %v587_v48 = vsub.f32 %v557_v40, %v1253_v43 }
 0x340   :  { %v1076_v42 = vpop.eup %1075 }
 0x341   :  { %v567_v45 = vmul.f32 %v1076_v42, %v557_v40 }
 0x343   :  { %v569_v46 = vsub.f32 2.0, %v567_v45 }
 0x345   :  { %v571_v47 = vmul.f32 %v1076_v42, %v569_v46 }
 0x347   :  { %579 = vperm.xlu2 %1047, %v571_v47  }
 0x34f   :  { %595 = vperm.xlu2 %1047, %v587_v48  }
 0x357   :  { %1049 = vset.pattern.permute.xlu2 %v1153_v49 }
 0x386   :  { %v591_v50 = vpop.permute.xlu2 %590 }
 0x391   :  { %v575_v51 = vpop.permute.xlu2 %574 }
 0x392   :  { %v582_v52 = vmul.f32 %v575_v51, %v556_v21  ;;  %v584_v53 = vmul.f32 %v575_v51, %v562_v22 }
 0x394   :  { %v598_v54 = vperm.slane %v582_v52, 3  ;;  %v604_v55 = vperm.slane %v584_v53, 3 }
 0x396   :  { %v600_v56 = vmul.f32 %v598_v54, %v591_v50  ;;  %v606_v57 = vmul.f32 %v604_v55, %v591_v50 }
 0x398   :  { %v602_v58 = vsub.f32 %v556_v21, %v600_v56  ;;  %v608_v59 = vsub.f32 %v562_v22, %v606_v57  ;;  %v1154_v22 = vmov 5  }
 0x399   :  { %1051 = vset.pattern.permute.xlu0 %v1154_v22 }
 0x39a   :  { %1077 = vrcp.f32 %v602_v58  ;;  %v632_v16 = vsub.f32 %v602_v58, %v1253_v43 }
 0x3a0   :  { %v1078_v60 = vpop.eup %1077 }
 0x3a1   :  { %v580_v61 = vpop.permute.xlu2 %579  ;;  %v612_v62 = vmul.f32 %v1078_v60, %v602_v58 }
 0x3a2   :  { %v585_v63 = vmul.f32 %v580_v61, %v563_v41  ;;  %v583_v5 = vmul.f32 %v580_v61, %v557_v40 }
 0x3a3   :  { %v614_v0 = vsub.f32 2.0, %v612_v62  ;;  %v106_v62 = vsel %vm52_vm0, %v1216_v4, 0.0 }
 0x3a4   :  { %v599_v8 = vperm.slane %v583_v5, 3  ;;  %v605_v9 = vperm.slane %v585_v63, 3  ;;  %v107_v63 = vsel %vm52_vm0, %v1206_v2, 0.0 }
 0x3a5   :  { %v616_v7 = vmul.f32 %v1078_v60, %v614_v0  ;;  %v108_v5 = vadd.f32 %v107_v63, %v106_v62 }
 0x3a7   :  { %620 = vperm.xlu1 %1048, %v616_v7  }
 0x3a9   :  { %v596_v10 = vpop.permute.xlu2 %595 }
 0x3aa   :  { %v601_v11 = vmul.f32 %v599_v8, %v596_v10  ;;  %v607_v12 = vmul.f32 %v605_v9, %v596_v10  ;;  %v109_v8 = vrot.slane %v108_v5, 4 }
 0x3ac   :  { %v603_v14 = vsub.f32 %v557_v40, %v601_v11  ;;  %v609_v15 = vsub.f32 %v563_v41, %v607_v12  ;;  %v110_v10 = vadd.f32 %v109_v8, %v108_v5 }
 0x3ae   :  { %1079 = vrcp.f32 %v603_v14  ;;  %v633_v21 = vsub.f32 %v603_v14, %v1253_v43  ;;  %v111_v12 = vrot.slane %v110_v10, 2 }
 0x3af   :  { %636 = vperm.xlu1 %1048, %v632_v16  }
 0x3b4   :  { %v1080_v17 = vpop.eup %1079 }
 0x3b5   :  { %v613_v18 = vmul.f32 %v1080_v17, %v603_v14 }
 0x3b7   :  { %v615_v19 = vsub.f32 2.0, %v613_v18  ;;  %1050 = vset.pattern.permute.xlu1 %v1154_v22 }
 0x3b9   :  { %v617_v20 = vmul.f32 %v1080_v17, %v615_v19 }
 0x3bb   :  { %625 = vperm.xlu2 %1049, %v617_v20  }
 0x3c3   :  { %641 = vperm.xlu2 %1049, %v633_v21  }
 0x3cb   :  { %1052 = vset.pattern.permute.xlu2 %v1154_v22 }
 0x415   :  { %v626_v23 = vpop.permute.xlu2 %625 }
 0x416   :  { %v631_v6 = vmul.f32 %v626_v23, %v609_v15  ;;  %v629_v13 = vmul.f32 %v626_v23, %v603_v14 }
 0x418   :  { %v645_v26 = vperm.slane %v629_v13, 4  ;;  %v651_v28 = vperm.slane %v631_v6, 4  ;;  %v1155_v6 = vmov 6  }
 0x419   :  { %v621_v24 = vpop.permute.xlu1 %620 }
 0x41a   :  { %v630_v25 = vmul.f32 %v621_v24, %v608_v59  ;;  %v628_v29 = vmul.f32 %v621_v24, %v602_v58 }
 0x41c   :  { %v644_v35 = vperm.slane %v628_v29, 4  ;;  %v650_v36 = vperm.slane %v630_v25, 4 }
 0x41d   :  { %v642_v30 = vpop.permute.xlu2 %641 }
 0x41e   :  { %v647_v31 = vmul.f32 %v645_v26, %v642_v30  ;;  %v653_v34 = vmul.f32 %v651_v28, %v642_v30 }
 0x420   :  { %v1280_v37 = vsub.f32 %v603_v14, %v647_v31  ;;  %v1282_v40 = vsub.f32 %v609_v15, %v653_v34  ;;  %v112_v15 = vadd.f32 %v111_v12, %v110_v10 }
 0x421   :  { %v637_v41 = vpop.permute.xlu1 %636 }
 0x422   :  { %v646_v42 = vmul.f32 %v644_v35, %v637_v41  ;;  %v652_v45 = vmul.f32 %v650_v36, %v637_v41  ;;  %1081 = vrcp.f32 %v1280_v37  ;;  %v679_v57 = vsub.f32 %v1280_v37, %v1253_v43 }
 0x423   :  { %v113_v16 = vrot.slane %v112_v15, 1 }
 0x424   :  { %v648_v46 = vsub.f32 %v602_v58, %v646_v42  ;;  %v654_v47 = vsub.f32 %v608_v59, %v652_v45  ;;  %v97_v58 = vsel %vm52_vm0, %v1203_v1, 0.0  ;;  %v98_v59 = vsel %vm52_vm0, %v1212_v3, 0.0 }
 0x425   :  { %v99_v60 = vadd.f32 %v98_v59, %v97_v58  ;;  %v114_v18 = vadd.f32 %v113_v16, %v112_v15  ;;  %v1156_v59 = vmov 7  }
 0x426   :  { %v678_v48 = vsub.f32 %v648_v46, %v1253_v43  ;;  %1083 = vrcp.f32 %v648_v46 }
 0x427   :  { %v100_v61 = vrot.slane %v99_v60, 4  ;;  %v123_v19 = vmul.f32 %v1224_v27, %v114_v18 }
 0x428   :  { %v1082_v49 = vpop.eup %1081  ;;  %682 = vperm.xlu2 %1052, %v678_v48  }
 0x429   :  { %v659_v50 = vmul.f32 %v1082_v49, %v1280_v37  ;;  %v101_v0 = vadd.f32 %v100_v61, %v99_v60  ;;  %v147_v20 = vsub.f32 %v1216_v4, %v123_v19  ;;  %v148_v23 = vsub.f32 %v1206_v2, %v123_v19 }
 0x42b   :  { %v661_v51 = vsub.f32 2.0, %v659_v50  ;;  %v102_v7 = vrot.slane %v101_v0, 2 }
 0x42c   :  { %v1084_v52 = vpop.eup %1083 }
 0x42d   :  { %v663_v53 = vmul.f32 %v1082_v49, %v661_v51  ;;  %v658_v54 = vmul.f32 %v1084_v52, %v648_v46  ;;  %v103_v9 = vadd.f32 %v102_v7, %v101_v0 }
 0x42f   :  { %671 = vperm.xlu0 %1051, %v663_v53   ;;  %v660_v55 = vsub.f32 2.0, %v658_v54  ;;  %v104_v11 = vrot.slane %v103_v9, 1 }
 0x431   :  { %v662_v56 = vmul.f32 %v1084_v52, %v660_v55  ;;  %v105_v14 = vadd.f32 %v104_v11, %v103_v9 }
 0x433   :  { %666 = vperm.xlu1 %1050, %v662_v56   ;;  %v122_v17 = vmul.f32 %v1224_v27, %v105_v14 }
 0x435   :  { %v145_v21 = vsub.f32 %v1203_v1, %v122_v17  ;;  %v146_v22 = vsub.f32 %v1212_v3, %v122_v17 }
 0x437   :  { %1053 = vset.pattern.permute.xlu0 %v1155_v6 }
 0x43b   :  { %687 = vperm.xlu1 %1050, %v679_v57  }
 0x44e   :  { %227 = vxpose.xlu2.b32.start [1/2] (short) (narrow) %v147_v20, 32 }
 0x456   :  { %228 = vxpose.xlu2.b32.end [2/2] (short) (narrow) %v148_v23, 32 }
 0x470   :  { %153 = vxpose.xlu1.b32.start [1/2] (short) (narrow) %v145_v21, 32 }
 0x478   :  { %154 = vxpose.xlu1.b32.end [2/2] (short) (narrow) %v146_v22, 32 }
 0x482   :  { %v683_v30 = vpop.permute.xlu2 %682 }
 0x4a1   :  { %v672_v13 = vpop.permute.xlu0 %671 }
 0x4a2   :  { %v675_v27 = vmul.f32 %v672_v13, %v1280_v37  ;;  %v677_v62 = vmul.f32 %v672_v13, %v1282_v40 }
 0x4a4   :  { %v691_v35 = vperm.slane %v675_v27, 5  ;;  %v697_v7 = vperm.slane %v677_v62, 5 }
 0x4a5   :  { %v667_v24 = vpop.permute.xlu1 %666 }
 0x4a6   :  { %v674_v25 = vmul.f32 %v667_v24, %v648_v46  ;;  %v676_v26 = vmul.f32 %v667_v24, %v654_v47 }
 0x4a8   :  { %v690_v28 = vperm.slane %v674_v25, 5  ;;  %v696_v29 = vperm.slane %v676_v26, 5 }
 0x4aa   :  { %v692_v31 = vmul.f32 %v690_v28, %v683_v30  ;;  %v698_v34 = vmul.f32 %v696_v29, %v683_v30 }
 0x4ac   :  { %v694_v36 = vsub.f32 %v648_v46, %v692_v31  ;;  %v700_v41 = vsub.f32 %v654_v47, %v698_v34 }
 0x4ad   :  { %v688_v42 = vpop.permute.xlu1 %687 }
 0x4ae   :  { %v693_v45 = vmul.f32 %v691_v35, %v688_v42  ;;  %v724_v48 = vsub.f32 %v694_v36, %v1253_v43  ;;  %1085 = vrcp.f32 %v694_v36  ;;  %v699_v10 = vmul.f32 %v697_v7, %v688_v42 }
 0x4b0   :  { %v695_v49 = vsub.f32 %v1280_v37, %v693_v45  ;;  %728 = vperm.xlu0 %1053, %v724_v48   ;;  %v701_v18 = vsub.f32 %v1282_v40, %v699_v10 }
 0x4b2   :  { %1087 = vrcp.f32 %v695_v49  ;;  %v725_v46 = vsub.f32 %v695_v49, %v1253_v43 }
 0x4b4   :  { %v1086_v50 = vpop.eup %1085 }
 0x4b5   :  { %v704_v51 = vmul.f32 %v1086_v50, %v694_v36 }
 0x4b7   :  { %v706_v52 = vsub.f32 2.0, %v704_v51 }
 0x4b8   :  { %v1088_v53 = vpop.eup %1087  ;;  %1055 = vset.pattern.permute.xlu2 %v1156_v59 }
 0x4b9   :  { %v708_v54 = vmul.f32 %v1086_v50, %v706_v52  ;;  %v705_v55 = vmul.f32 %v1088_v53, %v695_v49 }
 0x4bb   :  { %712 = vperm.xlu0 %1053, %v708_v54   ;;  %v707_v56 = vsub.f32 2.0, %v705_v55 }
 0x4bd   :  { %v709_v57 = vmul.f32 %v1088_v53, %v707_v56 }
 0x4c3   :  { %717 = vperm.xlu0 %1053, %v709_v57  }
 0x4cb   :  { %733 = vperm.xlu0 %1053, %v725_v46   ;;  %1056 = vset.pattern.permute.xlu1 %v1156_v59 }
 0x4d3   :  { %1054 = vset.pattern.permute.xlu0 %v1156_v59 }
 0x4e7   :  { %v243_v47 = vpop.trf.xlu2 }
 0x4e8   :  { %1001 = vmatmul.msk.f32.vlgmr.msra.gmra.mxu2 %vm185_vm3, %v243_v47 }
 0x4ef   :  { %v244_v58 = vpop.trf.xlu2 }
 0x4f0   :  { %1002 = vmatmul.msk.f32.gmra.mxu2 %vm185_vm3, %v244_v58 }
 0x4f7   :  { %v245_v61 = vpop.trf.xlu2 }
 0x4f8   :  { %1003 = vmatmul.msk.f32.gmra.mxu2 %vm185_vm3, %v245_v61 }
 0x4ff   :  { %v246_v5 = vpop.trf.xlu2 }
 0x500   :  { %1004 = vmatmul.msk.f32.gmra.mxu2 %vm185_vm3, %v246_v5 }
 0x514   :  { %v169_v37 = vpop.trf.xlu1 }
 0x515   :  { %997 = vmatmul.msk.f32.vlgmr.msrb.gmra.mxu1 %vm185_vm3, %v169_v37 }
 0x51c   :  { %v170_v63 = vpop.trf.xlu1 }
 0x51d   :  { %998 = vmatmul.msk.f32.gmra.mxu1 %vm185_vm3, %v170_v63 }
 0x522   :  { %v729_v60 = vpop.permute.xlu0 %728 }
 0x524   :  { %v171_v16 = vpop.trf.xlu1 }
 0x525   :  { %999 = vmatmul.msk.f32.gmra.mxu1 %vm185_vm3, %v171_v16 }
 0x52c   :  { %v172_v23 = vpop.trf.xlu1 }
 0x52d   :  { %v713_v0 = vpop.permute.xlu0 %712  ;;  %1000 = vmatmul.msk.f32.gmra.mxu1 %vm185_vm3, %v172_v23 }
 0x52e   :  { %v720_v8 = vmul.f32 %v713_v0, %v694_v36  ;;  %v722_v9 = vmul.f32 %v713_v0, %v700_v41 }
 0x530   :  { %v736_v11 = vperm.slane %v720_v8, 6  ;;  %v742_v12 = vperm.slane %v722_v9, 6 }
 0x532   :  { %v738_v14 = vmul.f32 %v736_v11, %v729_v60  ;;  %v744_v15 = vmul.f32 %v742_v12, %v729_v60 }
 0x534   :  { %v740_v17 = vsub.f32 %v694_v36, %v738_v14  ;;  %v746_v19 = vsub.f32 %v700_v41, %v744_v15 }
 0x535   :  { %v718_v20 = vpop.permute.xlu0 %717 }
 0x536   :  { %1089 = vrcp.f32 %v740_v17  ;;  %v723_v21 = vmul.f32 %v718_v20, %v701_v18  ;;  %v721_v22 = vmul.f32 %v718_v20, %v695_v49  ;;  %v768_v36 = vsub.f32 %v740_v17, %v1253_v43 }
 0x538   :  { %v737_v13 = vperm.slane %v721_v22, 6  ;;  %v743_v24 = vperm.slane %v723_v21, 6  ;;  %v50_v21 = vld [vmem:[%s1381_s5 + $0x10] sm:$0xff]  ;;  %v1057_v22 = vld [vmem:[%s1378_s2] ss:$0 sm:$0xff] }
 0x539   :  { %v873_v23 = vsub.f32 %v1057_v22, %v1237_v38 }
 0x53c   :  { %v1090_v6 = vpop.eup %1089 }
 0x53d   :  { %v734_v25 = vpop.permute.xlu0 %733  ;;  %v750_v26 = vmul.f32 %v1090_v6, %v740_v17 }
 0x53e   :  { %v739_v27 = vmul.f32 %v737_v13, %v734_v25  ;;  %v745_v28 = vmul.f32 %v743_v24, %v734_v25  ;;  %v51_v25 = vld [vmem:[%s1381_s5 + $0x18] sm:$0xff] }
 0x53f   :  { %v752_v29 = vsub.f32 2.0, %v750_v26  ;;  %v874_v26 = vsub.f32 %v1057_v22, %v1239_v39  ;;  %v878_v38 = vmul.f32 %v1258_v44, %v51_v25  ;;  %v49_v39 = vld [vmem:[%s1381_s5 + $0x8] sm:$0xff] }
 0x540   :  { %v741_v30 = vsub.f32 %v695_v49, %v739_v27  ;;  %v747_v31 = vsub.f32 %v701_v18, %v745_v28  ;;  %v48_v27 = vld [vmem:[%s1381_s5] sm:$0xff]  ;;  %s1157_s5 = smov [#allocation5]  }
 0x541   :  { %v754_v34 = vmul.f32 %v1090_v6, %v752_v29  ;;  %v877_v6 = vmul.f32 %v1258_v44, %v50_v21  ;;  %v882_v28 = vadd.f32 %v878_v38, %v874_v26  ;;  %v871_v29 = vsub.f32 %v1057_v22, %v1227_v32  ;;  %s977_s15 = sshll.u32 %s1157_s5, 4  ;;  %s978_s15 = int_to_ptr.vmem [resolvable:$true] %s977_s15 }
 0x542   :  { %1091 = vrcp.f32 %v741_v30  ;;  %v769_v40 = vsub.f32 %v741_v30, %v1253_v43 }
 0x543   :  { %758 = vperm.xlu0 %1054, %v754_v34   ;;  %v881_v24 = vadd.f32 %v877_v6, %v873_v23  ;;  %v872_v34 = vsub.f32 %v1057_v22, %v1229_v33 }
 0x544   :  { %777 = vperm.xlu1 %1056, %v769_v40   ;;  %v876_v40 = vmul.f32 %v1258_v44, %v49_v39 }
 0x548   :  { %v1092_v35 = vpop.eup %1091 }
 0x549   :  { %v751_v41 = vmul.f32 %v1092_v35, %v741_v30  ;;  %v875_v30 = vmul.f32 %v1258_v44, %v48_v27 }
 0x54b   :  { %772 = vperm.xlu0 %1054, %v768_v36   ;;  %v753_v42 = vsub.f32 2.0, %v751_v41 }
 0x54d   :  { %v755_v45 = vmul.f32 %v1092_v35, %v753_v42  ;;  %v880_v35 = vadd.f32 %v876_v40, %v872_v34 }
 0x54f   :  { %763 = vperm.xlu2 %1055, %v755_v45  }
 0x56b   :  { %v288_v50 = vpop.f32.mrf.mxu2 }
 0x56c   :  { %v304_v57 = vmul.f32 0.0625, %v288_v50 }
 0x573   :  { %v291_v47 = vpop.f32.mrf.mxu2 }
 0x574   :  { %v305_v61 = vmul.f32 0.0625, %v291_v47 }
 0x57b   :  { %v294_v63 = vpop.f32.mrf.mxu2 }
 0x57c   :  { %v306_v5 = vmul.f32 0.0625, %v294_v63 }
 0x583   :  { %v297_v8 = vpop.f32.mrf.mxu2 }
 0x584   :  { %v307_v10 = vmul.f32 0.0625, %v297_v8 }
 0x592   :  { %v215_v54 = vpop.f32.mrf.mxu1 }
 0x593   :  { %v300_v59 = vmul.f32 0.0625, %v215_v54 }
 0x59a   :  { %v218_v62 = vpop.f32.mrf.mxu1 }
 0x59b   :  { %v301_v0 = vmul.f32 0.0625, %v218_v62 }
 0x5a2   :  { %v221_v7 = vpop.f32.mrf.mxu1 }
 0x5a3   :  { %v302_v9 = vmul.f32 0.0625, %v221_v7 }
 0x5a9   :  { %v764_v48 = vpop.permute.xlu2 %763 }
 0x5aa   :  { %v767_v51 = vmul.f32 %v764_v48, %v747_v31  ;;  %v224_v11 = vpop.f32.mrf.mxu1 }
 0x5ab   :  { %v303_v12 = vmul.f32 0.0625, %v224_v11 }
 0x5ac   :  { %v781_v52 = vperm.slane %v767_v51, 7 }
 0x5b5   :  { %v759_v49 = vpop.permute.xlu0 %758 }
 0x5b6   :  { %v778_v53 = vpop.permute.xlu1 %777  ;;  %v766_v56 = vmul.f32 %v759_v49, %v746_v19 }
 0x5b7   :  { %v783_v55 = vmul.f32 %v781_v52, %v778_v53 }
 0x5b8   :  { %v780_v58 = vperm.slane %v766_v56, 7 }
 0x5b9   :  { %v785_v46 = vsub.f32 %v747_v31, %v783_v55  ;;  %v879_v31 = vadd.f32 %v875_v30, %v871_v29 }
 0x5bb   :  { %854 = vmatpush.msrb.mxu0 %v785_v46 }
 0x5bc   :  { %1011 = vmatmul.msk.f32.vlgmr.msrb.gmra.mxu0 %vm124_vm1, %v304_v57 }
 0x5bd   :  { %v773_v43 = vpop.permute.xlu0 %772 }
 0x5be   :  { %v782_v37 = vmul.f32 %v780_v58, %v773_v43 }
 0x5c0   :  { %v784_v60 = vsub.f32 %v746_v19, %v782_v37 }
 0x5c2   :  { %813 = vmatpush.msra.mxu3 %v784_v60 }
 0x5c3   :  { %1007 = vmatmul.msk.f32.vlgmr.msra.gmra.mxu3 %vm124_vm1, %v300_v59 }
 0x5c4   :  { %1012 = vmatmul.msk.f32.gmra.mxu0 %vm124_vm1, %v305_v61 }
 0x5cb   :  { %1008 = vmatmul.msk.f32.gmra.mxu3 %vm124_vm1, %v301_v0 }
 0x5cc   :  { %1013 = vmatmul.msk.f32.gmra.mxu0 %vm124_vm1, %v306_v5 }
 0x5d3   :  { %1009 = vmatmul.msk.f32.gmra.mxu3 %vm124_vm1, %v302_v9 }
 0x5d4   :  { %1014 = vmatmul.msk.f32.gmra.mxu0 %vm124_vm1, %v307_v10 }
 0x5db   :  { %1010 = vmatmul.msk.f32.gmra.mxu3 %vm124_vm1, %v303_v12 }
 0x639   :  { %v856_v14 = vpop.f32.mrf.mxu0 }
 0x641   :  { %v859_v15 = vpop.f32.mrf.mxu0 }
 0x646   :  { %v815_v16 = vpop.f32.mrf.mxu3 }
 0x649   :  { %v862_v17 = vpop.f32.mrf.mxu0 }
 0x64e   :  { %v818_v18 = vpop.f32.mrf.mxu3 }
 0x651   :  { %v865_v19 = vpop.f32.mrf.mxu0 }
 0x652   :  { %1021 = vmatpush.xpose.msk.msrb.mxu2 %vm124_vm1, %v865_v19 }
 0x656   :  { %v821_v20 = vpop.f32.mrf.mxu3  ;;  %1022 = vmatpush.xpose.msk.msrb.mxu2 %vm124_vm1, %v862_v17 }
 0x65a   :  { %1023 = vmatpush.xpose.msk.msrb.mxu2 %vm124_vm1, %v859_v15 }
 0x65e   :  { %v824_v13 = vpop.f32.mrf.mxu3  ;;  %1024 = vmatpush.xpose.msk.msrb.mxu2 %vm124_vm1, %v856_v14 }
 0x65f   :  { %1015 = vmatpush.xpose.msk.msra.mxu1 %vm124_vm1, %v824_v13 }
 0x661   :  { %1025 = vmatmul.msk.f32.vlgmr.msrb.gmra.mxu2 %vm124_vm1, %v881_v24 }
 0x663   :  { %1016 = vmatpush.xpose.msk.msra.mxu1 %vm124_vm1, %v821_v20 }
 0x667   :  { %1017 = vmatpush.xpose.msk.msra.mxu1 %vm124_vm1, %v818_v18 }
 0x669   :  { %1026 = vmatmul.msk.f32.gmra.mxu2 %vm124_vm1, %v882_v28 }
 0x66b   :  { %1018 = vmatpush.xpose.msk.msra.mxu1 %vm124_vm1, %v815_v16 }
 0x66e   :  { %1019 = vmatmul.msk.f32.vlgmr.msra.gmra.mxu1 %vm124_vm1, %v879_v31 }
 0x676   :  { %1020 = vmatmul.msk.f32.gmra.mxu1 %vm124_vm1, %v880_v35 }
 0x6e4   :  { %v959_v32 = vpop.f32.mrf.mxu2 }
 0x6e5   :  { %v967_v36 = vadd.f32 %v959_v32, %v1216_v4 }
 0x6e7   :  { %971 = vst.msk [vmem:[#allocation5 + $0x10] sm:$0xff] %vm52_vm0, %v967_v36 }
 0x6eb   :  { %v918_v41 = vpop.f32.mrf.mxu1 }
 0x6ec   :  { %v965_v42 = vadd.f32 %v918_v41, %v1203_v1  ;;  %v962_v45 = vpop.f32.mrf.mxu2 }
 0x6ed   :  { %v968_v48 = vadd.f32 %v962_v45, %v1206_v2 }
 0x6ee   :  { %969 = vst.msk [vmem:[#allocation5] sm:$0xff] %vm52_vm0, %v965_v42 }
 0x6ef   :  { %972 = vst.msk [vmem:[#allocation5 + $0x18] sm:$0xff] %vm52_vm0, %v968_v48 }
 0x6f3   :  { %v921_v33 = vpop.f32.mrf.mxu1 }
 0x6f4   :  { %v966_v4 = vadd.f32 %v921_v33, %v1212_v3 }
 0x6f6   :  { %970 = vst.msk [vmem:[#allocation5 + $0x8] sm:$0xff] %vm52_vm0, %v966_v4 }
 0x6f7   :  { %985 = dma.vmem_to_hbm [thread:$0]  %s978_s15, 512, %s980_s18, [#allocation4], %s1146_s26, %s1146_s26, %s1147_s27  }
 0x6f8   :  { %1143 = dma.done.wait [#allocation4], 512  }
 0x6f9   :  { %1144 = vsyncadd [#allocation4], 4294966784 }
 0x6fa   :  { %990 = vsyncpa [#allocation3], 1 }
 0x6fb   :  { %991 = vsyncpa [#allocation4], 1 }

</bundles_post_ra>
